<compile_context>
chip_gen: v7x
topology: tpu7x:2x2x1
jax: 0.10.0
libtpu: 0.0.40
codegen_flags: <defaults>
</compile_context>

<pallas_src>
import functools

import jax
import jax.numpy as jnp
from jax.experimental import pallas as pl
from jax.experimental.pallas import tpu as pltpu


def _fixed_power_law5_kernel(d_ref, o_ref, *, fmax, fmin):
    # jnp.log runs on the EUP (own bundle slot); the rest is VPU filler under
    # the memory bound.
    x = jnp.log(d_ref[...].astype(jnp.float32))
    # torch.nan_to_num(nan=fmax) defaults: nan -> fmax, +inf -> fmax, -inf -> fmin.
    x = jnp.where(jnp.isnan(x), fmax, jnp.clip(x, fmin, fmax))
    # Multiply AFTER nan_to_num (same order as torch); f32 overflow to +/-inf
    # exactly matches torch for d == 0 (log=-inf -> fmin -> +inf) and
    # d < 0 (log=nan -> fmax -> -inf).
    o_ref[...] = (-5.0 * x).astype(o_ref.dtype)


def _target_block_elems():
    """Elements per block: ~2 MiB f32 buffers on v5e, ~4 MiB on v6e/v7x."""
    try:
        kind = jax.devices()[0].device_kind.lower()
    except Exception:
        kind = ""
    if "v5" in kind:
        return 512 * 1024     # 8 MiB double-buffered in+out, under v5e's 16 MiB scoped default
    return 1024 * 1024        # 16 MiB double-buffered in+out, fits v6e/v7x 32 MiB scoped default


def _choose_blocks(rows, cols, target_elems):
    LANE, SUB = 128, 8
    # Lane-axis block: multiple of 128 when the last dim allows it (unmasked
    # full-vreg stores); otherwise the full (small) last dim.
    bl = cols if cols <= LANE else min(1024, (cols // LANE) * LANE)
    # Sublane-axis block: multiple of 8, or the full (small) dim.
    if rows <= SUB:
        br = rows
    else:
        br = max(SUB, (min(rows, target_elems // bl) // SUB) * SUB)
    return br, bl


@jax.jit
def fixed_power_law5_forward(d):
    """d: (B, Lq, Lk) -> (B, 1, Lq, Lk) == -5 * log(d).nan_to_num(finfo.max).unsqueeze(1)."""
    B, Lq, Lk = d.shape
    rows = B * Lq
    # Natural 2-D view: contiguous reshape, no pad / slice / extra HBM pass.
    d2 = d.reshape(rows, Lk)

    br, bl = _choose_blocks(rows, Lk, _target_block_elems())
    grid = (pl.cdiv(rows, br), pl.cdiv(Lk, bl))

    fmax = float(jnp.finfo(d.dtype).max)
    fmin = float(jnp.finfo(d.dtype).min)
    n = rows * Lk
    out_dtype = d.dtype

    out2 = pl.pallas_call(
        functools.partial(_fixed_power_law5_kernel, fmax=fmax, fmin=fmin),
        out_shape=jax.ShapeDtypeStruct((rows, Lk), out_dtype),
        grid=grid,
        in_specs=[pl.BlockSpec((br, bl), lambda i, j: (i, j))],
        out_specs=pl.BlockSpec((br, bl), lambda i, j: (i, j)),
        compiler_params=pltpu.CompilerParams(
            dimension_semantics=("parallel", "parallel")),  # shards blocks across TCs on v7x
        cost_estimate=pl.CostEstimate(
            flops=3 * n,
            transcendentals=n,
            bytes_accessed=n * (d.dtype.itemsize + jnp.dtype(out_dtype).itemsize)),
    )(d2)

    # unsqueeze(1): contiguous reshape, no transpose / extra HBM pass.
    return out2.reshape(B, 1, Lq, Lk)


def _reference(d):
    x = jnp.log(d)
    # jnp.nan_to_num defaults match torch: posinf -> finfo.max, neginf -> finfo.min.
    x = jnp.nan_to_num(x, nan=float(jnp.finfo(d.dtype).max))
    return (-5.0 * x)[:, None, :, :]


def _check(d):
    out = jax.block_until_ready(fixed_power_law5_forward(d))
    ref = _reference(d)
    assert out.shape == (d.shape[0], 1, d.shape[1], d.shape[2]), out.shape
    finite = jnp.isfinite(ref)
    close_finite = jnp.abs(out - ref) <= 1e-5 + 1e-5 * jnp.abs(ref)
    ok = jnp.where(finite, close_finite, out == ref)   # +/-inf must match exactly
    assert bool(jnp.all(ok)), "mismatch vs reference"


if __name__ == "__main__":
    key = jax.random.PRNGKey(0)

    # Small shape from the module's forward: (B, Lq, Lk) distance map.
    B, L = 2, 8
    d = 4.0 * jax.random.uniform(key, (B, L, L), jnp.float32) + 1e-3
    # Exercise the nan_to_num paths: log(0) = -inf, log(-1) = nan.
    d = d.at[0, 0, 0].set(0.0)
    d = d.at[0, 0, 1].set(-1.0)
    _check(d)

    # A ragged shape (rows % 8 != 0, Lk % 128 != 0) to exercise masked edge blocks.
    k2 = jax.random.PRNGKey(1)
    d2 = 4.0 * jax.random.uniform(k2, (2, 37, 200), jnp.float32) + 1e-3
    d2 = d2.at[1, 5, 3].set(0.0)
    d2 = d2.at[0, 36, 199].set(-2.0)
    _check(d2)

    print("KERNEL_OK")
</pallas_src>

<mosaic_0001>
module attributes {stable_mosaic.version = 11 : i64} {
  func.func @_fixed_power_law5_kernel(%arg0: i32, %arg1: i32, %arg2: memref<16x8xf32, #tpu.memory_space<vmem>>, %arg3: memref<16x8xf32, #tpu.memory_space<vmem>>) attributes {dimension_semantics = [#tpu.dimension_semantics<parallel>, #tpu.dimension_semantics<parallel>], iteration_bounds = array<i64: 1, 1>, scalar_prefetch = 0 : i64, scratch_operands = 0 : i64, tpu.core_type = #tpu.core_type<tc>, window_params = [{transform_indices = @transform_0, window_bounds = array<i64: 16, 8>}, {transform_indices = @transform_1, window_bounds = array<i64: 16, 8>}]} {
    %c0 = arith.constant 0 : index
    %c0_0 = arith.constant 0 : index
    %0 = vector.load %arg2[%c0, %c0_0] : memref<16x8xf32, #tpu.memory_space<vmem>>, vector<16x8xf32>
    %1 = math.log %0 : vector<16x8xf32>
    %2 = arith.cmpf one, %1, %1 : vector<16x8xf32>
    %cst = arith.constant -3.40282347E+38 : f32
    %cst_1 = arith.constant 3.40282347E+38 : f32
    %3 = vector.broadcast %cst : f32 to vector<16x8xf32>
    %4 = arith.maximumf %3, %1 : vector<16x8xf32>
    %5 = vector.broadcast %cst_1 : f32 to vector<16x8xf32>
    %6 = arith.minimumf %5, %4 : vector<16x8xf32>
    %cst_2 = arith.constant 3.40282347E+38 : f32
    %7 = vector.broadcast %cst_2 : f32 to vector<16x8xf32>
    %8 = arith.select %2, %7, %6 : vector<16x8xi1>, vector<16x8xf32>
    %cst_3 = arith.constant -5.000000e+00 : f32
    %9 = vector.broadcast %cst_3 : f32 to vector<16x8xf32>
    %10 = arith.mulf %9, %8 : vector<16x8xf32>
    %c0_4 = arith.constant 0 : index
    %c0_5 = arith.constant 0 : index
    %11 = vector.load %arg3[%c0_4, %c0_5] : memref<16x8xf32, #tpu.memory_space<vmem>>, vector<16x8xf32>
    tpu.vector_store %arg3[%c0_4, %c0_5], %10 {strides = array<i32>} : memref<16x8xf32, #tpu.memory_space<vmem>>, vector<16x8xf32>,
    return
  }
  func.func @transform_0(%arg0: i32, %arg1: i32) -> (i32, i32) {
    %c0_i32 = arith.constant 0 : i32
    return %arg0, %arg1 : i32, i32
  }
  func.func @transform_1(%arg0: i32, %arg1: i32) -> (i32, i32) {
    %c0_i32 = arith.constant 0 : i32
    return %arg0, %arg1 : i32, i32
  }
}

</mosaic_0001>

<bundles_post_ra>
// kernel: fixed_power_law5_forward.1
= control target key start
LH: loop header
LB: loop body
LE: loop exit
PB: predicated region body
PF: predicated region fallthrough
CT: control target
= control target key end

     0   :  { %6 = vsyncpa [#allocation3], 0  ;;  %s161_s0 = inlined_call_operand.hbm [shape: f32[16,8], index: 0, kind: input, shape index: {}]   ;;  %s162_s1 = inlined_call_operand.hbm [shape: f32[16,8], index: 1, kind: output, shape index: {}]  }
   0x1   :  { %7 = vsyncpa [#allocation4], 0  ;;  %s117_s6 = smov [#allocation2]   ;;  %s69_s10 = scalar_lea.hbm %s161_s0, 256 }
   0x2   :  { %s13_s7 = sshll.u32 %s117_s6, 4  ;;  %p70_p0 = scmp.ne.s32.totalorder %s161_s0, %s69_s10  ;;  %s14_s7 = int_to_ptr.vmem [resolvable:$true] %s13_s7 }
   0x3   :  { %p73_p1 = scmp.lt.u32.totalorder %s69_s10, %s161_s0 }
   0x5   :  { %p75_p2 = pnand %p73_p1, %p70_p0 }
   0x7   :  { %78 = shalt.err (!%p75_p2)
}
   0x8   :  { %s79_s15 = scalar_lea.vmem %s14_s7, 256  ;;  %p84_p4 = scmp.lt.s32.totalorder %s14_s7, %s14_s7 }
   0x9   :  { %p80_p3 = scmp.ne.s32.totalorder %s14_s7, %s79_s15  ;;  %p85_p5 = scmp.lt.s32.totalorder %s79_s15, %s79_s15 }
   0xb   :  { %p86_p6 = por %p85_p5, %p84_p4 }
   0xd   :  { %p87_p7 = pnand %p86_p6, %p80_p3 }
   0xf   :  { %90 = shalt.err (!%p87_p7)
}
  0x10   :  { %s118_s16 = smov 128   ;;  %s119_s17 = smov 8  }
  0x11   :  { %19 = dma.hbm_to_vmem [thread:$0]  %s161_s0, 256, %s14_s7, [#allocation3], %s118_s16, %s118_s16, %s119_s17  }
  0x12   :  { %113 = dma.done.wait [#allocation3], 256  }
  0x13   :  { %114 = vsyncadd [#allocation3], 4294967040  ;;  %v23_v0 = vld [vmem:[#allocation2] sm:$0xff]  ;;  %v24_v1 = vld [vmem:[#allocation2 + $0x8] sm:$0xff]  ;;  %s120_s20 = smov [#allocation5]   ;;  %vm39_vm2 = vcmask 64512  }
  0x14   :  { %65 = vlog2.f32 %v23_v0  ;;  %s47_s21 = sshll.u32 %s120_s20, 4  ;;  %s48_s21 = int_to_ptr.vmem [resolvable:$true] %s47_s21 }
  0x15   :  { %67 = vlog2.f32 %v24_v1  ;;  %s91_s0 = scalar_lea.vmem %s48_s21, 256  ;;  %p96_p9 = scmp.lt.s32.totalorder %s48_s21, %s48_s21 }
  0x16   :  { %p92_p8 = scmp.ne.s32.totalorder %s48_s21, %s91_s0  ;;  %p97_p10 = scmp.lt.s32.totalorder %s91_s0, %s91_s0 }
  0x18   :  { %p98_p11 = por %p97_p10, %p96_p9 }
  0x1a   :  { %p99_p12 = pnand %p98_p11, %p92_p8 }
  0x1e   :  { %v66_v2 = vpop.eup %65 }
  0x1f   :  { %v68_v3 = vpop.eup %67  ;;  %v26_v4 = vmul.f32 0.6931472, %v66_v2 }
  0x20   :  { %v28_v5 = vmul.f32 0.6931472, %v68_v3 }
  0x21   :  { %vm29_vm0 = vcmp.ne.f32.partialorder %v26_v4, %v26_v4  ;;  %v59_v6 = vclamps-f32 %v26_v4, 3.4028235e+38 }
  0x22   :  { %vm30_vm1 = vcmp.ne.f32.partialorder %v28_v5, %v28_v5  ;;  %v60_v7 = vclamps-f32 %v28_v5, 3.4028235e+38 }
  0x23   :  { %v35_v8 = vsel %vm29_vm0, 3.4028235e+38, %v59_v6 }
  0x24   :  { %v37_v9 = vmul.f32 -5.0, %v35_v8  ;;  %v36_v10 = vsel %vm30_vm1, 3.4028235e+38, %v60_v7 }
  0x25   :  { %v38_v11 = vmul.f32 -5.0, %v36_v10 }
  0x26   :  { %40 = vst.msk [vmem:[#allocation5] sm:$0xff] %vm39_vm2, %v37_v9 }
  0x27   :  { %41 = vst.msk [vmem:[#allocation5 + $0x8] sm:$0xff] %vm39_vm2, %v38_v11 }
  0x28   :  { %102 = shalt.err (!%p99_p12)
}
  0x29   :  { %s103_s24 = scalar_lea.hbm %s162_s1, 256 }
  0x2a   :  { %p104_p13 = scmp.ne.s32.totalorder %s162_s1, %s103_s24  ;;  %p107_p0 = scmp.lt.u32.totalorder %s103_s24, %s162_s1 }
  0x2c   :  { %p109_p1 = pnand %p107_p0, %p104_p13 }
  0x2e   :  { %112 = shalt.err (!%p109_p1)
}
  0x2f   :  { %53 = dma.vmem_to_hbm [thread:$0]  %s48_s21, 256, %s162_s1, [#allocation4], %s118_s16, %s118_s16, %s119_s17  }
  0x30   :  { %115 = dma.done.wait [#allocation4], 256  }
  0x31   :  { %116 = vsyncadd [#allocation4], 4294967040 }
  0x32   :  { %57 = vsyncpa [#allocation3], 1 }
  0x33   :  { %58 = vsyncpa [#allocation4], 1 }

</bundles_post_ra>
